<compile_context>
chip_gen: v7x
topology: tpu7x:2x2x1
jax: 0.10.0
libtpu: 0.0.40
codegen_flags: <defaults>
</compile_context>

<pallas_src>
import functools

import jax
import jax.numpy as jnp
from jax.experimental import pallas as pl
from jax.experimental.pallas import tpu as pltpu


LANE = 128


def encoder_kernel(x_ref, w1_ref, b1_ref, wmv_ref, bmv_ref, noise_ref,
                   out_ref, h_acc, eps_scr, *, var_eps: float, n_out: int, n_out_p: int):
    k = pl.program_id(1)

    @pl.when(k == 0)
    def _():
        h_acc[...] = jnp.zeros_like(h_acc)

    # Hidden-layer matmul over this K slab: bf16 operands, f32 accumulation in VMEM.
    h_acc[...] += jnp.dot(x_ref[...], w1_ref[...], preferred_element_type=jnp.float32)

    @pl.when(k == pl.num_programs(1) - 1)
    def _():
        # BatchNorm(eval) is folded into w1/b1; Dropout is identity in eval mode.
        h = jnp.maximum(h_acc[...] + b1_ref[...], 0.0)

        # Fused mean/var heads: a single MXU pass over (n_hidden, 2*n_out_p).
        mv = jnp.dot(h.astype(wmv_ref.dtype), wmv_ref[...],
                     preferred_element_type=jnp.float32) + bmv_ref[...]
        q_m = mv[:, :n_out_p]                       # lane-aligned split
        v_pre = mv[:, n_out_p:2 * n_out_p]

        # Variance head: softplus(.) + var_eps, clamped to [var_eps, 100].
        q_v = jnp.clip(jnp.logaddexp(v_pre, 0.0) + var_eps, var_eps, 100.0)

        # Pad the (tile_b, n_out) noise stream to n_out_p lanes inside VMEM
        # (avoids the 8x-inflated HBM noise read of the previous version).
        eps_scr[...] = jnp.zeros_like(eps_scr)
        eps_scr[:, :n_out] = noise_ref[...]
        z = q_m + jnp.sqrt(q_v) * eps_scr[...]      # reparam sample; identity z_transformation

        # Three aligned, unmasked lane-dense stores into the packed output slab.
        out_ref[:, 0:n_out_p] = q_m
        out_ref[:, n_out_p:2 * n_out_p] = q_v
        out_ref[:, 2 * n_out_p:3 * n_out_p] = z
        # TODO(synk): PyTorch raises ValueError on NaNs in q_m/q_v; no in-kernel exception
        # mechanism on TPU — an optional wrapper-side check mirrors it (check_nan=True).


def _pick_tile_b(B):
    """Batch tile: whole batch when tiny; otherwise >=2 grid steps (v7x has 2 TCs sharing
    the 'parallel' axis), capped at 512 rows (v6e/v7x MXU is 256 wide in M)."""
    if B <= 32:
        return B
    if B > 1024:
        return 512
    half = -(-B // 2)
    return -(-half // 8) * 8   # round up to a multiple of 8 (sublane constraint)


def prepare_params(params, *, compute_dtype=jnp.bfloat16, lane=LANE,
                   k_tile_threshold=1024, tile_k_large=512):
    """One-time parameter transform: fold BatchNorm(eval) into the first Linear,
    fuse + zero-pad the two head Linears into one lane-dense matmul, cast MXU
    operands to bf16, and choose the K (n_input) tiling."""
    n_in, n_hidden = params["w1"].shape
    n_out = params["wm"].shape[1]
    n_out_p = max(lane, -(-n_out // lane) * lane)

    # Fold BN: (x@w1 + b1)*scale + shift == x@(w1*scale) + (b1*scale + shift)
    w1f = params["w1"] * params["bn_scale"]
    b1f = params["b1"] * params["bn_scale"] + params["bn_shift"]

    # K tiling: single step for moderate n_input; 512-wide K slabs (zero-padded) otherwise.
    if n_in <= k_tile_threshold:
        tile_k, n_in_p = n_in, n_in
    else:
        tile_k = tile_k_large
        n_in_p = -(-n_in // tile_k) * tile_k
    if n_in_p != n_in:
        w1f = jnp.zeros((n_in_p, n_hidden), jnp.float32).at[:n_in].set(w1f)

    # Fused, zero-padded head: columns [0:n_out] = mean, [n_out_p:n_out_p+n_out] = var.
    w_mv = jnp.zeros((n_hidden, 2 * n_out_p), jnp.float32)
    w_mv = w_mv.at[:, :n_out].set(params["wm"])
    w_mv = w_mv.at[:, n_out_p:n_out_p + n_out].set(params["wv"])
    b_mv = jnp.zeros((1, 2 * n_out_p), jnp.float32)
    b_mv = b_mv.at[:, :n_out].set(params["bm"][0])
    b_mv = b_mv.at[:, n_out_p:n_out_p + n_out].set(params["bv"][0])

    return {"w1": w1f.astype(compute_dtype), "b1": b1f.astype(jnp.float32),
            "w_mv": w_mv.astype(compute_dtype), "b_mv": b_mv.astype(jnp.float32),
            "n_in": n_in, "n_in_p": n_in_p, "tile_k": tile_k,
            "n_out": n_out, "n_out_p": n_out_p}


def encoder_forward(x, fused, noise, *, var_eps=1e-4, tile_b=None, check_nan=False):
    B, n_in = x.shape
    assert n_in == fused["n_in"]
    n_in_p, tile_k = fused["n_in_p"], fused["tile_k"]
    n_hidden = fused["w1"].shape[1]
    n_out, n_out_p = fused["n_out"], fused["n_out_p"]
    compute_dtype = fused["w1"].dtype

    if tile_b is None:
        tile_b = _pick_tile_b(B)
    grid_b = -(-B // tile_b)
    B_p = grid_b * tile_b
    grid = (grid_b, n_in_p // tile_k)

    # Cast the activation stream to the MXU dtype; zero-pad ragged batch / K remainder.
    x_p = x.astype(compute_dtype)
    if B_p != B or n_in_p != n_in:
        x_p = jnp.zeros((B_p, n_in_p), compute_dtype).at[:B, :n_in].set(x_p)
    noise_p = noise.astype(jnp.float32)
    if B_p != B:
        noise_p = jnp.zeros((B_p, n_out), jnp.float32).at[:B].set(noise_p)

    kernel = functools.partial(encoder_kernel, var_eps=var_eps,
                               n_out=n_out, n_out_p=n_out_p)

    # Scoped-VMEM budget sized from the actual footprint (v5e default is only 16 MiB).
    wsz = fused["w1"].dtype.itemsize
    vmem_bytes = (2 * tile_b * tile_k * wsz            # x tile (double-buffered)
                  + 2 * tile_k * n_hidden * wsz        # w1 K-slab (double-buffered)
                  + 2 * n_hidden * 2 * n_out_p * wsz   # fused head weights
                  + 2 * (n_hidden + 2 * n_out_p) * 4   # biases
                  + 2 * tile_b * n_out * 4             # noise tile
                  + 2 * tile_b * 3 * n_out_p * 4       # packed output tile
                  + tile_b * (n_hidden + n_out_p) * 4) # f32 scratch (h acc + padded noise)
    vmem_limit = min(128 << 20, max(32 << 20, int(vmem_bytes * 1.5)))

    out = pl.pallas_call(
        kernel,
        out_shape=jax.ShapeDtypeStruct((B_p, 3 * n_out_p), jnp.float32),
        grid_spec=pltpu.PrefetchScalarGridSpec(
            num_scalar_prefetch=0,
            grid=grid,
            in_specs=[
                pl.BlockSpec((tile_b, tile_k), lambda i, k: (i, k)),         # x (bf16)
                pl.BlockSpec((tile_k, n_hidden), lambda i, k: (k, 0)),       # w1 (BN folded, bf16)
                pl.BlockSpec((1, n_hidden), lambda i, k: (0, 0)),            # b1 (f32)
                pl.BlockSpec((n_hidden, 2 * n_out_p), lambda i, k: (0, 0)),  # fused head W (bf16)
                pl.BlockSpec((1, 2 * n_out_p), lambda i, k: (0, 0)),         # fused head b (f32)
                pl.BlockSpec((tile_b, n_out), lambda i, k: (i, 0)),          # noise (unpadded)
            ],
            out_specs=pl.BlockSpec((tile_b, 3 * n_out_p), lambda i, k: (i, 0)),
            scratch_shapes=[pltpu.VMEM((tile_b, n_hidden), jnp.float32),   # hidden accumulator
                            pltpu.VMEM((tile_b, n_out_p), jnp.float32)],   # padded noise
        ),
        compiler_params=pltpu.CompilerParams(
            dimension_semantics=("parallel", "arbitrary"),
            vmem_limit_bytes=vmem_limit),
    )(x_p, fused["w1"], fused["b1"], fused["w_mv"], fused["b_mv"], noise_p)

    q_m = out[:B, 0:n_out]
    q_v = out[:B, n_out_p:n_out_p + n_out]
    z = out[:B, 2 * n_out_p:2 * n_out_p + n_out]

    if check_nan:
        # Mirrors the PyTorch ValueError; needs concrete values (do not use under jit).
        if bool(jnp.isnan(q_m).any()) or bool(jnp.isnan(q_v).any()):
            raise ValueError("NaNs detected in encoder output: check input or initialization.")
    return q_m, q_v, z


def init_params(key, n_input, n_hidden, n_output):
    """Deterministic init mimicking PyTorch Linear (uniform +/- 1/sqrt(fan_in))
    and BatchNorm1d defaults (gamma=1, beta=0, running stats 0/1, eps=1e-3)."""
    ks = jax.random.split(key, 6)

    def linear(kw, kb, fan_in, fan_out):
        bound = 1.0 / jnp.sqrt(fan_in)
        w = jax.random.uniform(kw, (fan_in, fan_out), jnp.float32, -bound, bound)
        b = jax.random.uniform(kb, (1, fan_out), jnp.float32, -bound, bound)
        return w, b

    w1, b1 = linear(ks[0], ks[1], n_input, n_hidden)
    wm, bm = linear(ks[2], ks[3], n_hidden, n_output)
    wv, bv = linear(ks[4], ks[5], n_hidden, n_output)

    bn_eps = 1e-3
    gamma = jnp.ones((1, n_hidden), jnp.float32)
    beta = jnp.zeros((1, n_hidden), jnp.float32)
    running_mean = jnp.zeros((1, n_hidden), jnp.float32)
    running_var = jnp.ones((1, n_hidden), jnp.float32)
    bn_scale = gamma / jnp.sqrt(running_var + bn_eps)
    bn_shift = beta - running_mean * bn_scale

    return {"w1": w1, "b1": b1, "bn_scale": bn_scale, "bn_shift": bn_shift,
            "wm": wm, "bm": bm, "wv": wv, "bv": bv}


def reference_forward(x, params, noise, var_eps=1e-4):
    """Exact f32 reference of the PyTorch Encoder forward (eval mode)."""
    h = x @ params["w1"] + params["b1"]
    h = h * params["bn_scale"] + params["bn_shift"]
    h = jnp.maximum(h, 0.0)
    q_m = h @ params["wm"] + params["bm"]
    q_v = jax.nn.softplus(h @ params["wv"] + params["bv"]) + var_eps
    q_v = jnp.clip(q_v, var_eps, 100.0)
    z = q_m + jnp.sqrt(q_v) * noise
    return q_m, q_v, z


if __name__ == "__main__":
    B, n_input, n_hidden, n_output = 16, 32, 128, 16

    key = jax.random.PRNGKey(0)
    k_par, k_x, k_noise = jax.random.split(key, 3)
    params = init_params(k_par, n_input, n_hidden, n_output)
    x = jax.random.normal(k_x, (B, n_input), jnp.float32)
    noise = jax.random.normal(k_noise, (B, n_output), jnp.float32)  # rsample eps

    fused = prepare_params(params)                       # bf16 MXU operands by default
    q_m, q_v, latent = encoder_forward(x, fused, noise, check_nan=True)
    jax.block_until_ready((q_m, q_v, latent))

    rm, rv, rz = reference_forward(x, params, noise)
    # bf16 operands (f32 accumulation) -> compare against the f32 reference with a
    # bf16-appropriate tolerance.
    assert q_m.shape == rm.shape and q_v.shape == rv.shape and latent.shape == rz.shape
    assert jnp.allclose(q_m, rm, atol=5e-2, rtol=5e-2)
    assert jnp.allclose(q_v, rv, atol=5e-2, rtol=5e-2)
    assert jnp.allclose(latent, rz, atol=5e-2, rtol=5e-2)

    print("KERNEL_OK")
</pallas_src>

<mosaic_0001>
module attributes {stable_mosaic.version = 11 : i64} {
  func.func @encoder_kernel(%arg0: i32, %arg1: i32, %arg2: memref<16x32xbf16, #tpu.memory_space<vmem>>, %arg3: memref<32x128xbf16, #tpu.memory_space<vmem>>, %arg4: memref<1x128xf32, #tpu.memory_space<vmem>>, %arg5: memref<128x256xbf16, #tpu.memory_space<vmem>>, %arg6: memref<1x256xf32, #tpu.memory_space<vmem>>, %arg7: memref<16x16xf32, #tpu.memory_space<vmem>>, %arg8: memref<16x384xf32, #tpu.memory_space<vmem>>, %arg9: memref<16x128xf32, #tpu.memory_space<vmem>>, %arg10: memref<16x128xf32, #tpu.memory_space<vmem>>) attributes {dimension_semantics = [#tpu.dimension_semantics<parallel>, #tpu.dimension_semantics<arbitrary>], iteration_bounds = array<i64: 1, 1>, scalar_prefetch = 0 : i64, scratch_operands = 2 : i64, tpu.core_type = #tpu.core_type<tc>, window_params = [{transform_indices = @transform_0, window_bounds = array<i64: 16, 32>}, {transform_indices = @transform_1, window_bounds = array<i64: 32, 128>}, {pipeline_mode = #tpu.pipeline_mode<synchronous>, transform_indices = @transform_2, window_bounds = array<i64: 1, 128>}, {pipeline_mode = #tpu.pipeline_mode<synchronous>, transform_indices = @transform_3, window_bounds = array<i64: 128, 256>}, {pipeline_mode = #tpu.pipeline_mode<synchronous>, transform_indices = @transform_4, window_bounds = array<i64: 1, 256>}, {transform_indices = @transform_5, window_bounds = array<i64: 16, 16>}, {transform_indices = @transform_6, window_bounds = array<i64: 16, 384>}]} {
    %c0_i32 = arith.constant 0 : i32
    %0 = arith.cmpi eq, %arg1, %c0_i32 : i32
    %1 = arith.extui %0 : i1 to i32
    %c0_i32_0 = arith.constant 0 : i32
    %2 = arith.cmpi ne, %1, %c0_i32_0 : i32
    scf.if %2 {
      %cst_10 = arith.constant 0.000000e+00 : f32
      %12 = vector.broadcast %cst_10 : f32 to vector<16x128xf32>
      %c0_11 = arith.constant 0 : index
      %c0_12 = arith.constant 0 : index
      %13 = vector.load %arg9[%c0_11, %c0_12] : memref<16x128xf32, #tpu.memory_space<vmem>>, vector<16x128xf32>
      tpu.vector_store %arg9[%c0_11, %c0_12], %12 {strides = array<i32>} : memref<16x128xf32, #tpu.memory_space<vmem>>, vector<16x128xf32>,
    } else {
    }
    %c0 = arith.constant 0 : index
    %c0_1 = arith.constant 0 : index
    %3 = vector.load %arg9[%c0, %c0_1] : memref<16x128xf32, #tpu.memory_space<vmem>>, vector<16x128xf32>
    %c0_2 = arith.constant 0 : index
    %c0_3 = arith.constant 0 : index
    %4 = vector.load %arg2[%c0_2, %c0_3] : memref<16x32xbf16, #tpu.memory_space<vmem>>, vector<16x32xbf16>
    %c0_4 = arith.constant 0 : index
    %c0_5 = arith.constant 0 : index
    %5 = vector.load %arg3[%c0_4, %c0_5] : memref<32x128xbf16, #tpu.memory_space<vmem>>, vector<32x128xbf16>
    %cst = arith.constant dense<0.000000e+00> : vector<16x128xf32>
    %6 = tpu.matmul %4, %5, %cst {dimension_numbers = #tpu.dot_dimension_numbers<[1], [0], [0], [1], [0, 0, 1, 1], [], []>} : vector<16x32xbf16>, vector<32x128xbf16>, vector<16x128xf32> -> vector<16x128xf32>
    %7 = arith.addf %3, %6 : vector<16x128xf32>
    %c0_6 = arith.constant 0 : index
    %c0_7 = arith.constant 0 : index
    %8 = vector.load %arg9[%c0_6, %c0_7] : memref<16x128xf32, #tpu.memory_space<vmem>>, vector<16x128xf32>
    tpu.vector_store %arg9[%c0_6, %c0_7], %7 {strides = array<i32>} : memref<16x128xf32, #tpu.memory_space<vmem>>, vector<16x128xf32>,
    %c0_i32_8 = arith.constant 0 : i32
    %9 = arith.cmpi eq, %arg1, %c0_i32_8 : i32
    %10 = arith.extui %9 : i1 to i32
    %c0_i32_9 = arith.constant 0 : i32
    %11 = arith.cmpi ne, %10, %c0_i32_9 : i32
    scf.if %11 {
      %c0_10 = arith.constant 0 : index
      %c0_11 = arith.constant 0 : index
      %12 = vector.load %arg9[%c0_10, %c0_11] : memref<16x128xf32, #tpu.memory_space<vmem>>, vector<16x128xf32>
      %c0_12 = arith.constant 0 : index
      %c0_13 = arith.constant 0 : index
      %13 = vector.load %arg4[%c0_12, %c0_13] : memref<1x128xf32, #tpu.memory_space<vmem>>, vector<1x128xf32>
      %14 = vector.broadcast %13 : vector<1x128xf32> to vector<16x128xf32>
      %15 = arith.addf %12, %14 : vector<16x128xf32>
      %cst_14 = arith.constant 0.000000e+00 : f32
      %16 = vector.broadcast %cst_14 : f32 to vector<16x128xf32>
      %17 = arith.maximumf %15, %16 : vector<16x128xf32>
      %18 = arith.truncf %17 : vector<16x128xf32> to vector<16x128xbf16>
      %c0_15 = arith.constant 0 : index
      %c0_16 = arith.constant 0 : index
      %19 = vector.load %arg5[%c0_15, %c0_16] : memref<128x256xbf16, #tpu.memory_space<vmem>>, vector<128x256xbf16>
      %cst_17 = arith.constant dense<0.000000e+00> : vector<16x256xf32>
      %20 = tpu.matmul %18, %19, %cst_17 {dimension_numbers = #tpu.dot_dimension_numbers<[1], [0], [0], [1], [0, 0, 1, 1], [], []>} : vector<16x128xbf16>, vector<128x256xbf16>, vector<16x256xf32> -> vector<16x256xf32>
      %c0_18 = arith.constant 0 : index
      %c0_19 = arith.constant 0 : index
      %21 = vector.load %arg6[%c0_18, %c0_19] : memref<1x256xf32, #tpu.memory_space<vmem>>, vector<1x256xf32>
      %22 = vector.broadcast %21 : vector<1x256xf32> to vector<16x256xf32>
      %23 = arith.addf %20, %22 : vector<16x256xf32>
      %24 = vector.extract_strided_slice %23 {offsets = [0, 0], sizes = [16, 128], strides = [1, 1]} : vector<16x256xf32> to vector<16x128xf32>
      %25 = vector.extract_strided_slice %23 {offsets = [0, 128], sizes = [16, 128], strides = [1, 1]} : vector<16x256xf32> to vector<16x128xf32>
      %cst_20 = arith.constant 0.000000e+00 : f32
      %26 = vector.broadcast %cst_20 : f32 to vector<16x128xf32>
      %27 = arith.maximumf %25, %26 : vector<16x128xf32>
      %28 = vector.broadcast %cst_20 : f32 to vector<16x128xf32>
      %29 = arith.subf %25, %28 : vector<16x128xf32>
      %30 = arith.cmpf one, %29, %29 : vector<16x128xf32>
      %31 = vector.broadcast %cst_20 : f32 to vector<16x128xf32>
      %32 = arith.addf %25, %31 : vector<16x128xf32>
      %33 = math.absf %29 : vector<16x128xf32>
      %cst_21 = arith.constant 0.000000e+00 : f32
      %34 = vector.broadcast %cst_21 : f32 to vector<16x128xf32>
      %35 = arith.subf %34, %33 : vector<16x128xf32>
      %36 = math.exp %35 : vector<16x128xf32>
      %37 = math.log1p %36 : vector<16x128xf32>
      %38 = arith.addf %27, %37 : vector<16x128xf32>
      %39 = arith.select %30, %32, %38 : vector<16x128xi1>, vector<16x128xf32>
      %cst_22 = arith.constant 9.99999974E-5 : f32
      %40 = vector.broadcast %cst_22 : f32 to vector<16x128xf32>
      %41 = arith.addf %39, %40 : vector<16x128xf32>
      %cst_23 = arith.constant 9.99999974E-5 : f32
      %cst_24 = arith.constant 1.000000e+02 : f32
      %42 = vector.broadcast %cst_23 : f32 to vector<16x128xf32>
      %43 = arith.maximumf %42, %41 : vector<16x128xf32>
      %44 = vector.broadcast %cst_24 : f32 to vector<16x128xf32>
      %45 = arith.minimumf %44, %43 : vector<16x128xf32>
      %cst_25 = arith.constant 0.000000e+00 : f32
      %46 = vector.broadcast %cst_25 : f32 to vector<16x128xf32>
      %c0_26 = arith.constant 0 : index
      %c0_27 = arith.constant 0 : index
      %47 = vector.load %arg10[%c0_26, %c0_27] : memref<16x128xf32, #tpu.memory_space<vmem>>, vector<16x128xf32>
      tpu.vector_store %arg10[%c0_26, %c0_27], %46 {strides = array<i32>} : memref<16x128xf32, #tpu.memory_space<vmem>>, vector<16x128xf32>,
      %c0_28 = arith.constant 0 : index
      %c0_29 = arith.constant 0 : index
      %48 = vector.load %arg7[%c0_28, %c0_29] : memref<16x16xf32, #tpu.memory_space<vmem>>, vector<16x16xf32>
      %c0_30 = arith.constant 0 : index
      %c0_31 = arith.constant 0 : index
      %49 = vector.load %arg10[%c0_30, %c0_31] : memref<16x128xf32, #tpu.memory_space<vmem>>, vector<16x16xf32>
      tpu.vector_store %arg10[%c0_30, %c0_31], %48 {strides = array<i32>} : memref<16x128xf32, #tpu.memory_space<vmem>>, vector<16x16xf32>,
      %50 = math.sqrt %45 : vector<16x128xf32>
      %c0_32 = arith.constant 0 : index
      %c0_33 = arith.constant 0 : index
      %51 = vector.load %arg10[%c0_32, %c0_33] : memref<16x128xf32, #tpu.memory_space<vmem>>, vector<16x128xf32>
      %52 = arith.mulf %50, %51 : vector<16x128xf32>
      %53 = arith.addf %24, %52 : vector<16x128xf32>
      %c0_34 = arith.constant 0 : index
      %c0_35 = arith.constant 0 : index
      %54 = vector.load %arg8[%c0_34, %c0_35] : memref<16x384xf32, #tpu.memory_space<vmem>>, vector<16x128xf32>
      tpu.vector_store %arg8[%c0_34, %c0_35], %24 {strides = array<i32>} : memref<16x384xf32, #tpu.memory_space<vmem>>, vector<16x128xf32>,
      %c0_36 = arith.constant 0 : index
      %c128 = arith.constant 128 : index
      %55 = vector.load %arg8[%c0_36, %c128] : memref<16x384xf32, #tpu.memory_space<vmem>>, vector<16x128xf32>
      tpu.vector_store %arg8[%c0_36, %c128], %45 {strides = array<i32>} : memref<16x384xf32, #tpu.memory_space<vmem>>, vector<16x128xf32>,
      %c0_37 = arith.constant 0 : index
      %c256 = arith.constant 256 : index
      %56 = vector.load %arg8[%c0_37, %c256] : memref<16x384xf32, #tpu.memory_space<vmem>>, vector<16x128xf32>
      tpu.vector_store %arg8[%c0_37, %c256], %53 {strides = array<i32>} : memref<16x384xf32, #tpu.memory_space<vmem>>, vector<16x128xf32>,
    } else {
    }
    return
  }
  func.func @transform_0(%arg0: i32, %arg1: i32) -> (i32, i32) {
    %c0_i32 = arith.constant 0 : i32
    return %arg0, %arg1 : i32, i32
  }
  func.func @transform_1(%arg0: i32, %arg1: i32) -> (i32, i32) {
    %c0_i32 = arith.constant 0 : i32
    %c0_i32_0 = arith.constant 0 : i32
    return %arg1, %c0_i32 : i32, i32
  }
  func.func @transform_2(%arg0: i32, %arg1: i32) -> (i32, i32) {
    %c0_i32 = arith.constant 0 : i32
    %c0_i32_0 = arith.constant 0 : i32
    %c0_i32_1 = arith.constant 0 : i32
    return %c0_i32, %c0_i32_0 : i32, i32
  }
  func.func @transform_3(%arg0: i32, %arg1: i32) -> (i32, i32) {
    %c0_i32 = arith.constant 0 : i32
    %c0_i32_0 = arith.constant 0 : i32
    %c0_i32_1 = arith.constant 0 : i32
    return %c0_i32, %c0_i32_0 : i32, i32
  }
  func.func @transform_4(%arg0: i32, %arg1: i32) -> (i32, i32) {
    %c0_i32 = arith.constant 0 : i32
    %c0_i32_0 = arith.constant 0 : i32
    %c0_i32_1 = arith.constant 0 : i32
    return %c0_i32, %c0_i32_0 : i32, i32
  }
  func.func @transform_5(%arg0: i32, %arg1: i32) -> (i32, i32) {
    %c0_i32 = arith.constant 0 : i32
    %c0_i32_0 = arith.constant 0 : i32
    return %arg0, %c0_i32 : i32, i32
  }
  func.func @transform_6(%arg0: i32, %arg1: i32) -> (i32, i32) {
    %c0_i32 = arith.constant 0 : i32
    %c0_i32_0 = arith.constant 0 : i32
    return %arg0, %c0_i32 : i32, i32
  }
}

</mosaic_0001>

<bundles_post_ra>
// kernel: tpu_custom_call.1
= control target key start
LH: loop header
LB: loop body
LE: loop exit
PB: predicated region body
PF: predicated region fallthrough
CT: control target
= control target key end

     0   :  { %11 = vsyncpa [#allocation5], 0  ;;  %s763_s0 = inlined_call_operand.hbm [shape: bf16[16,32], index: 0, kind: input, shape index: {}]   ;;  %s764_s1 = inlined_call_operand.hbm [shape: bf16[32,128], index: 1, kind: input, shape index: {}]   ;;  %s765_s2 = inlined_call_operand.hbm [shape: f32[1,128], index: 2, kind: input, shape index: {}]   ;;  %s766_s3 = inlined_call_operand.hbm [shape: bf16[128,256], index: 3, kind: input, shape index: {}]   ;;  %s767_s4 = inlined_call_operand.vmem [shape: f32[1,256], index: 4, kind: input, shape index: {}]   ;;  %s768_s5 = inlined_call_operand.vmem [shape: f32[16,16], index: 5, kind: input, shape index: {}]   ;;  %s769_s6 = inlined_call_operand.hbm [shape: f32[16,384], index: 6, kind: output, shape index: {}]  }
   0x1   :  { %12 = vsyncpa [#allocation8], 0 }
   0x2   :  { %13 = vsyncpa [#allocation11], 0 }
   0x3   :  { %14 = vsyncpa [#allocation6], 0  ;;  %s623_s21 = smov [#allocation7]   ;;  %s624_s23 = smov [#allocation4]  }
   0x4   :  { %s32_s22 = sshll.u32 %s623_s21, 4  ;;  %s20_s24 = sshll.u32 %s624_s23, 4  ;;  %s33_s22 = int_to_ptr.vmem [resolvable:$true] %s32_s22  ;;  %s672_s24 = int_to_ptr.vmem [resolvable:$true] %s20_s24 }
   0x5   :  { %s505_s27 = scalar_lea.hbm %s764_s1, 256 }
   0x6   :  { %p506_p0 = scmp.ne.s32.totalorder %s764_s1, %s505_s27  ;;  %p509_p1 = scmp.lt.u32.totalorder %s505_s27, %s764_s1 }
   0x8   :  { %p511_p2 = pnand %p509_p1, %p506_p0 }
   0xa   :  { %514 = shalt.err (!%p511_p2)
}
   0xb   :  { %s515_s8 = scalar_lea.vmem %s33_s22, 256  ;;  %p520_p4 = scmp.lt.s32.totalorder %s33_s22, %s33_s22 }
   0xc   :  { %p516_p3 = scmp.ne.s32.totalorder %s33_s22, %s515_s8  ;;  %p521_p5 = scmp.lt.s32.totalorder %s515_s8, %s515_s8 }
   0xe   :  { %p522_p6 = por %p521_p5, %p520_p4 }
  0x10   :  { %p523_p7 = pnand %p522_p6, %p516_p3 }
  0x12   :  { %526 = shalt.err (!%p523_p7)
}
  0x13   :  { %s625_s9 = smov 64   ;;  %s626_s10 = smov 4  }
  0x14   :  { %38 = dma.hbm_to_vmem [thread:$0]  %s764_s1, 256, %s33_s22, [#allocation8], %s625_s9, %s625_s9, %s626_s10  }
  0x15   :  { %s527_s15 = scalar_lea.hbm %s763_s0, 128 }
  0x16   :  { %p528_p8 = scmp.ne.s32.totalorder %s763_s0, %s527_s15  ;;  %p531_p9 = scmp.lt.u32.totalorder %s527_s15, %s763_s0 }
  0x18   :  { %p533_p10 = pnand %p531_p9, %p528_p8 }
  0x1a   :  { %536 = shalt.err (!%p533_p10)
}
  0x1b   :  { %s537_s20 = scalar_lea.vmem %s672_s24, 128  ;;  %p542_p12 = scmp.lt.s32.totalorder %s672_s24, %s672_s24 }
  0x1c   :  { %p538_p11 = scmp.ne.s32.totalorder %s672_s24, %s537_s20  ;;  %p543_p13 = scmp.lt.s32.totalorder %s537_s20, %s537_s20 }
  0x1e   :  { %p544_p0 = por %p543_p13, %p542_p12 }
  0x20   :  { %p545_p1 = pnand %p544_p0, %p538_p11 }
  0x22   :  { %548 = shalt.err (!%p545_p1)
}
  0x23   :  { %26 = dma.hbm_to_vmem [thread:$0]  %s763_s0, 128, %s672_s24, [#allocation5], %s625_s9, %s625_s9, %s626_s10  }
  0x24   :  { %s627_s22 = smov [#allocation9]   ;;  %s628_s25 = smov [#allocation10]  }
  0x25   :  { %s45_s23 = sshll.u32 %s627_s22, 4  ;;  %s54_s26 = sshll.u32 %s628_s25, 4  ;;  %s46_s23 = int_to_ptr.vmem [resolvable:$true] %s45_s23  ;;  %s703_s26 = int_to_ptr.vmem [resolvable:$true] %s54_s26 }
  0x26   :  { %s549_s29 = scalar_lea.hbm %s765_s2, 16 }
  0x27   :  { %p550_p2 = scmp.ne.s32.totalorder %s765_s2, %s549_s29  ;;  %p553_p3 = scmp.lt.u32.totalorder %s549_s29, %s765_s2 }
  0x29   :  { %p555_p4 = pnand %p553_p3, %p550_p2 }
  0x2b   :  { %558 = shalt.err (!%p555_p4)
}
  0x2c   :  { %s559_s0 = scalar_lea.vmem %s46_s23, 16  ;;  %s563_s24 = scalar_lea.vmem %s46_s23, 32 }
  0x2d   :  { %p560_p5 = scmp.ne.s32.totalorder %s46_s23, %s559_s0  ;;  %p564_p6 = scmp.lt.s32.totalorder %s46_s23, %s46_s23 }
  0x2e   :  { %p565_p7 = scmp.lt.s32.totalorder %s563_s24, %s559_s0 }
  0x30   :  { %p566_p8 = por %p565_p7, %p564_p6 }
  0x32   :  { %p567_p9 = pnand %p566_p8, %p560_p5 }
  0x34   :  { %570 = shalt.err (!%p567_p9)
}
  0x35   :  { %48 = dma.hbm_to_vmem [thread:$0]  %s765_s2, 16, %s46_s23, [#allocation8]  }
  0x36   :  { %s571_s14 = scalar_lea.hbm %s766_s3, 2048 }
  0x37   :  { %p572_p10 = scmp.ne.s32.totalorder %s766_s3, %s571_s14  ;;  %p575_p11 = scmp.lt.u32.totalorder %s571_s14, %s766_s3 }
  0x39   :  { %p577_p12 = pnand %p575_p11, %p572_p10 }
  0x3b   :  { %580 = shalt.err (!%p577_p12)
}
  0x3c   :  { %s581_s19 = scalar_lea.vmem %s703_s26, 2048  ;;  %p586_p0 = scmp.lt.s32.totalorder %s703_s26, %s703_s26 }
  0x3d   :  { %p582_p13 = scmp.ne.s32.totalorder %s703_s26, %s581_s19  ;;  %p587_p1 = scmp.lt.s32.totalorder %s581_s19, %s581_s19 }
  0x3f   :  { %p588_p2 = por %p587_p1, %p586_p0 }
  0x41   :  { %p589_p3 = pnand %p588_p2, %p582_p13 }
  0x43   :  { %592 = shalt.err (!%p589_p3)
}
  0x44   :  { %s629_s2 = smov 128   ;;  %s630_s20 = smov 8  }
  0x45   :  { %60 = dma.hbm_to_vmem [thread:$0]  %s766_s3, 2048, %s703_s26, [#allocation11], %s629_s2, %s629_s2, %s630_s20  }
  0x46   :  { %615 = dma.done.wait [#allocation5], 128  }
  0x47   :  { %616 = vsyncadd [#allocation5], 4294967168 }
  0x48   :  { %617 = dma.done.wait [#allocation8], 272  }
  0x49   :  { %618 = vsyncadd [#allocation8], 4294967024 }
  0x4a   :  { %619 = dma.done.wait [#allocation11], 2048  }
  0x4b   :  { %620 = vsyncadd [#allocation11], 4294965248  ;;  %v631_v0 = vmov 0.0   ;;  %vm632_vm0 = vmmov 0   ;;  %vm372_vm1 = vcmask 130048   ;;  %v370_v1 = vld [vmem:[%s768_s5] sm:$0xff]  ;;  %v193_v33 = vlaneseq }
  0x4c   :  { %444 = vmatprep.subr.bf16.mxu0 %v631_v0  ;;  %368 = vst [vmem:[#allocation3] sm:$0xff] %v631_v0  ;;  %369 = vst [vmem:[#allocation3 + $0x8] sm:$0xff] %v631_v0  ;;  %448 = vmatprep.mubr.msk.bf16.mxu0 %vm632_vm0, %v631_v0  ;;  %v371_v2 = vld [vmem:[%s768_s5 + $0x8] sm:$0xff]  ;;  %v467_v4 = vld [vmem:[#allocation7 + $0x8] sm:$0xff]   ;;  %vm109_vm2 = vcmask 261120   ;;  %v633_v22 = vmov 0  }
  0x4d   :  { %373 = vst.msk [vmem:[#allocation3] sm:$0xff] %vm372_vm1, %v370_v1  ;;  %374 = vst.msk [vmem:[#allocation3 + $0x8] sm:$0xff] %vm372_vm1, %v371_v2  ;;  %v466_v3 = vld [vmem:[#allocation7] sm:$0xff]   ;;  %v471_v6 = vld [vmem:[#allocation10] ss:$8 sps:$4 sm:$0xff]   ;;  %315 = vmatprep.mubr.bf16.mxu1 %v633_v22  ;;  %v194_v34 = vshrl.u32 %v193_v33, 7 }
  0x4e   :  { %445 = vmatpush3.bf16.msra.mxu0 %v466_v3  ;;  %v469_v5 = vld [vmem:[#allocation10 + $0x4] ss:$8 sps:$4 sm:$0xff]   ;;  %v472_v7 = vld [vmem:[#allocation10 + $0x14] ss:$8 sps:$4 sm:$0xff]   ;;  %v474_v9 = vld [vmem:[#allocation10 + $0x10] ss:$8 sps:$4 sm:$0xff]  }
  0x4f   :  { %446 = vmatprep.subr.bf16.mxu0 %v631_v0  ;;  %v468_v8 = vld [vmem:[#allocation4] sm:$0xff]   ;;  %283 = vmatprep.subr.bf16.mxu1 %v469_v5  ;;  %v478_v12 = vld [vmem:[#allocation10 + $0x34] ss:$8 sps:$4 sm:$0xff]   ;;  %v480_v13 = vld [vmem:[#allocation10 + $0x30] ss:$8 sps:$4 sm:$0xff]   ;;  %v195_v35 = vsub.s32 0, %v194_v34 }
  0x50   :  { %284 = vmatpush1.bf16.msra.mxu1 %v471_v6  ;;  %v475_v10 = vld [vmem:[#allocation10 + $0x24] ss:$8 sps:$4 sm:$0xff]   ;;  %v477_v11 = vld [vmem:[#allocation10 + $0x20] ss:$8 sps:$4 sm:$0xff]   ;;  %v484_v16 = vld [vmem:[#allocation10 + $0x54] ss:$8 sps:$4 sm:$0xff]  }
  0x51   :  { %285 = vmatprep.subr.bf16.mxu1 %v472_v7  ;;  %v481_v14 = vld [vmem:[#allocation10 + $0x44] ss:$8 sps:$4 sm:$0xff]   ;;  %v483_v15 = vld [vmem:[#allocation10 + $0x40] ss:$8 sps:$4 sm:$0xff]   ;;  %v486_v17 = vld [vmem:[#allocation10 + $0x50] ss:$8 sps:$4 sm:$0xff]  }
  0x52   :  { %447 = vmatpush3.bf16.msra.mxu0 %v467_v4  ;;  %v487_v18 = vld [vmem:[#allocation10 + $0x64] ss:$8 sps:$4 sm:$0xff]   ;;  %v489_v19 = vld [vmem:[#allocation10 + $0x60] ss:$8 sps:$4 sm:$0xff]   ;;  %v490_v20 = vld [vmem:[#allocation10 + $0x74] ss:$8 sps:$4 sm:$0xff]  }
  0x53   :  { %v492_v21 = vld [vmem:[#allocation10 + $0x70] ss:$8 sps:$4 sm:$0xff]   ;;  %v424_v23 = vld [vmem:[#allocation9] ss:$0 sm:$0xff]  ;;  %v191_v36 = vld [vmem:[%s767_s4] sm:$0x3] }
  0x54   :  { %286 = vmatpush1.bf16.msra.mxu1 %v474_v9  ;;  %v199_v37 = vsub.s32 1, %v194_v34  ;;  %v196_v38 = vrot.slane %v191_v36, %v195_v35  ;;  %s634_s4 = smov [#allocation12]  }
  0x55   :  { %449 = vmatmul.mubr.msk.bf16.vlgmr.msra.gmra.mrb[0].mxu0 %vm109_vm2, %v468_v8  ;;  %287 = vmatprep.subr.bf16.mxu1 %v475_v10  ;;  %s406_s26 = sshll.u32 %s634_s4, 4  ;;  %s407_s26 = int_to_ptr.vmem [resolvable:$true] %s406_s26 }
  0x56   :  { %v200_v39 = vrot.slane %v191_v36, %v199_v37  ;;  %s593_s28 = scalar_lea.vmem %s407_s26, 768  ;;  %p598_p5 = scmp.lt.s32.totalorder %s407_s26, %s407_s26 }
  0x57   :  { %p594_p4 = scmp.ne.s32.totalorder %s407_s26, %s593_s28  ;;  %p599_p6 = scmp.lt.s32.totalorder %s593_s28, %s593_s28 }
  0x58   :  { %288 = vmatpush1.bf16.msra.mxu1 %v477_v11 }
  0x59   :  { %289 = vmatprep.subr.bf16.mxu1 %v478_v12  ;;  %p600_p7 = por %p599_p6, %p598_p5 }
  0x5b   :  { %p601_p8 = pnand %p600_p7, %p594_p4 }
  0x5c   :  { %290 = vmatpush1.bf16.msra.mxu1 %v480_v13 }
  0x5d   :  { %291 = vmatprep.subr.bf16.mxu1 %v481_v14 }
  0x60   :  { %292 = vmatpush1.bf16.msra.mxu1 %v483_v15 }
  0x61   :  { %293 = vmatprep.subr.bf16.mxu1 %v484_v16 }
  0x64   :  { %294 = vmatpush1.bf16.msra.mxu1 %v486_v17 }
  0x65   :  { %295 = vmatprep.subr.bf16.mxu1 %v487_v18 }
  0x68   :  { %296 = vmatpush1.bf16.msra.mxu1 %v489_v19 }
  0x69   :  { %297 = vmatprep.subr.bf16.mxu1 %v490_v20 }
  0x6c   :  { %298 = vmatpush1.bf16.msra.mxu1 %v492_v21 }
 0x128   :  { %v147_v24 = vpop.f32.mrb[0].mxu0 }
 0x129   :  { %v170_v25 = vadd.f32 %v424_v23, %v147_v24  ;;  %v450_v26 = vpop.f32.mrb[1].mxu0  ;;  %v389_v24 = vld [vmem:[#allocation3] sm:$0xff] }
 0x12a   :  { %v150_v27 = vpop.f32.mrb[2].mxu0 }
 0x12b   :  { %v171_v28 = vadd.f32 %v424_v23, %v150_v27  ;;  %v451_v29 = vpop.f32.mrb[3].mxu0  ;;  %v172_v30 = vmax.f32 %v170_v25, 0.0 }
 0x12c   :  { %v390_v29 = vld [vmem:[#allocation3 + $0x8] sm:$0xff] }
 0x12d   :  { %v173_v31 = vmax.f32 %v171_v28, 0.0 }
 0x12f   :  { %v174_v32 = vpack.c.bf16 %v173_v31, %v172_v30 }
 0x131   :  { %316 = vmatmul.mubr.bf16.vlgmr.msra.gmra.mrb[0].mxu1 %v174_v32 }
 0x204   :  { %v317_v40 = vpop.f32.mrb[0].mxu1 }
 0x205   :  { %v743_v41 = vadd.f32 %v317_v40, %v196_v38  ;;  %v319_v42 = vpop.f32.mrb[1].mxu1 }
 0x206   :  { %v320_v43 = vadd.f32 %v319_v42, %v200_v39  ;;  %v321_v44 = vpop.f32.mrb[2].mxu1 }
 0x207   :  { %395 = vst [vmem:[#allocation12] sm:$0xff] %v743_v41  ;;  %v746_v45 = vadd.f32 %v321_v44, %v196_v38  ;;  %v323_v46 = vpop.f32.mrb[3].mxu1 }
 0x208   :  { %v332_v47 = vand.u32 2147483647, %v320_v43  ;;  %v324_v48 = vadd.f32 %v323_v46, %v200_v39  ;;  %v326_v4 = vmax.f32 %v320_v43, 0.0  ;;  %vm328_vm5 = vcmp.ne.f32.partialorder %v320_v43, %v320_v43 }
 0x209   :  { %396 = vst [vmem:[#allocation12 + $0x18] sm:$0xff] %v746_v45 }
 0x20a   :  { %v334_v49 = vsub.f32 0.0, %v332_v47  ;;  %v333_v50 = vand.u32 2147483647, %v324_v48  ;;  %v327_v9 = vmax.f32 %v324_v48, 0.0  ;;  %vm329_vm6 = vcmp.ne.f32.partialorder %v324_v48, %v324_v48 }
 0x20c   :  { %v336_v51 = vmul.f32 1.442695, %v334_v49  ;;  %v335_v52 = vsub.f32 0.0, %v333_v50 }
 0x20e   :  { %493 = vpow2.f32 %v336_v51  ;;  %v338_v53 = vmul.f32 1.442695, %v335_v52 }
 0x210   :  { %495 = vpow2.f32 %v338_v53 }
 0x218   :  { %v494_v54 = vpop.eup %493 }
 0x219   :  { %v340_v55 = vadd.f32 1.0, %v494_v54  ;;  %v343_v58 = vmul.f32 -0.5, %v494_v54  ;;  %v346_v61 = vand.u32 2147483647, %v494_v54 }
 0x21a   :  { %v496_v56 = vpop.eup %495 }
 0x21b   :  { %497 = vlog2.f32 %v340_v55  ;;  %v349_v57 = vadd.f32 1.0, %v496_v56  ;;  %v352_v59 = vmul.f32 -0.5, %v496_v56  ;;  %v344_v60 = vadd.f32 1.0, %v343_v58 }
 0x21c   :  { %v355_v0 = vand.u32 2147483647, %v496_v56  ;;  %vm347_vm3 = vcmp.lt.f32.partialorder %v346_v61, 0.0004427343 }
 0x21d   :  { %499 = vlog2.f32 %v349_v57  ;;  %v353_v62 = vadd.f32 1.0, %v352_v59  ;;  %v345_v2 = vmul.f32 %v494_v54, %v344_v60 }
 0x21e   :  { %vm356_vm4 = vcmp.lt.f32.partialorder %v355_v0, 0.0004427343 }
 0x21f   :  { %v354_v7 = vmul.f32 %v496_v56, %v353_v62 }
 0x225   :  { %v498_v63 = vpop.eup %497 }
 0x226   :  { %v342_v1 = vmul.f32 0.6931472, %v498_v63 }
 0x227   :  { %v500_v3 = vpop.eup %499 }
 0x228   :  { %v348_v5 = vsel %vm347_vm3, %v345_v2, %v342_v1  ;;  %v351_v6 = vmul.f32 0.6931472, %v500_v3 }
 0x229   :  { %v358_v8 = vadd.f32 %v348_v5, %v326_v4 }
 0x22a   :  { %v357_v10 = vsel %vm356_vm4, %v354_v7, %v351_v6 }
 0x22b   :  { %v360_v11 = vsel %vm328_vm5, %v320_v43, %v358_v8  ;;  %v359_v12 = vadd.f32 %v357_v10, %v327_v9 }
 0x22c   :  { %v362_v13 = vadd.f32 0.0001, %v360_v11 }
 0x22d   :  { %v361_v14 = vsel %vm329_vm6, %v324_v48, %v359_v12 }
 0x22e   :  { %v364_v15 = vmax.f32 %v362_v13, 0.0001  ;;  %v363_v16 = vadd.f32 0.0001, %v361_v14 }
 0x230   :  { %v366_v17 = vmin.f32 %v364_v15, 100.0  ;;  %v365_v18 = vmax.f32 %v363_v16, 0.0001 }
 0x232   :  { %501 = vrsqrt.f32 %v366_v17  ;;  %397 = vst [vmem:[#allocation12 + $0x8] sm:$0xff] %v366_v17  ;;  %v367_v19 = vmin.f32 %v365_v18, 100.0  ;;  %vm377_vm7 = vcmp.eq.f32.partialorder %v366_v17, inf  ;;  %v380_v23 = vand.u32 2147483648, %v366_v17 }
 0x233   :  { %vm379_vm8 = vcmp.eq.f32.partialorder %v366_v17, 0.0 }
 0x234   :  { %503 = vrsqrt.f32 %v367_v19  ;;  %398 = vst [vmem:[#allocation12 + $0x20] sm:$0xff] %v367_v19  ;;  %vm384_vm9 = vcmp.eq.f32.partialorder %v367_v19, inf  ;;  %v387_v28 = vand.u32 2147483648, %v367_v19  ;;  %vm386_vm10 = vcmp.eq.f32.partialorder %v367_v19, 0.0 }
 0x23c   :  { %v502_v20 = vpop.eup %501 }
 0x23d   :  { %v376_v21 = vmul.f32 %v502_v20, %v366_v17 }
 0x23e   :  { %v504_v22 = vpop.eup %503 }
 0x23f   :  { %v383_v25 = vmul.f32 %v504_v22, %v367_v19  ;;  %v378_v26 = vsel %vm377_vm7, %v366_v17, %v376_v21 }
 0x240   :  { %v381_v27 = vsel %vm379_vm8, %v380_v23, %v378_v26 }
 0x241   :  { %v385_v30 = vsel %vm384_vm9, %v367_v19, %v383_v25  ;;  %v391_v31 = vmul.f32 %v389_v24, %v381_v27 }
 0x242   :  { %v388_v32 = vsel %vm386_vm10, %v387_v28, %v385_v30 }
 0x243   :  { %v392_v33 = vmul.f32 %v390_v29, %v388_v32  ;;  %v393_v34 = vadd.f32 %v391_v31, %v743_v41 }
 0x245   :  { %v394_v35 = vadd.f32 %v392_v33, %v746_v45  ;;  %399 = vst [vmem:[#allocation12 + $0x10] sm:$0xff] %v393_v34 }
 0x247   :  { %400 = vst [vmem:[#allocation12 + $0x28] sm:$0xff] %v394_v35 }
 0x248   :  { %604 = shalt.err (!%p601_p8)
}
 0x249   :  { %s605_s7 = scalar_lea.hbm %s769_s6, 768 }
 0x24a   :  { %p606_p9 = scmp.ne.s32.totalorder %s769_s6, %s605_s7  ;;  %p609_p10 = scmp.lt.u32.totalorder %s605_s7, %s769_s6 }
 0x24c   :  { %p611_p11 = pnand %p609_p10, %p606_p9 }
 0x24e   :  { %614 = shalt.err (!%p611_p11)
}
 0x24f   :  { %s635_s9 = smov 384   ;;  %s636_s10 = smov 24  }
 0x250   :  { %412 = dma.vmem_to_hbm [thread:$0]  %s407_s26, 768, %s769_s6, [#allocation6], %s635_s9, %s635_s9, %s636_s10  }
 0x251   :  { %621 = dma.done.wait [#allocation6], 768  }
 0x252   :  { %622 = vsyncadd [#allocation6], 4294966528 }
 0x253   :  { %416 = vsyncpa [#allocation5], 1 }
 0x254   :  { %417 = vsyncpa [#allocation8], 1 }
 0x255   :  { %418 = vsyncpa [#allocation11], 1 }
 0x256   :  { %419 = vsyncpa [#allocation6], 1 }

</bundles_post_ra>
